<compile_context>
chip_gen: v6e
topology: v6e:2x2x1
jax: 0.10.0
libtpu: 0.0.40
codegen_flags: <defaults>
</compile_context>

<pallas_src>
import functools

import jax
import jax.numpy as jnp
from jax import lax
from jax.experimental import pallas as pl
from jax.experimental.pallas import tpu as pltpu


KERNEL_SIZE = 7
NUM_ITER = 50


def _block_diag_band(n, cell, nblocks, p, dtype):
    """(n, n) matrix: 1 iff |i-j| <= p and i, j fall in the same `cell`-sized
    block (blocks 0..nblocks-1); rows/cols beyond nblocks*cell are all-zero."""
    i = lax.broadcasted_iota(jnp.int32, (n, n), 0)
    j = lax.broadcasted_iota(jnp.int32, (n, n), 1)
    band = jnp.abs(i - j) <= p

    def in_block(b):
        lo = b * cell
        hi = lo + cell
        return ((i >= lo) & (i < hi)) & ((j >= lo) & (j < hi))

    same = in_block(0)
    for b in range(1, nblocks):          # trace-time unrolled; nblocks small
        same = same | in_block(b)
    return (band & same).astype(dtype)


def _holefill_kernel(x_ref, o_ref, *, img_h, img_w, rblk, cblk,
                     kernel_size, num_iter):
    """One (HPp, WPp) slab: rblk x cblk images packed along sublanes/lanes."""
    HPp, WPp = x_ref.shape
    p = (kernel_size - 1) // 2

    # Band matrices generated in-kernel (no HBM traffic, no double-buffering).
    # Both are exact in bf16 (0/1 entries).
    a_bf16 = _block_diag_band(HPp, img_h, rblk, p, jnp.bfloat16)    # rows
    bm_bf16 = _block_diag_band(WPp, img_w, cblk, p, jnp.bfloat16)   # cols

    x0 = x_ref[...].astype(jnp.float32)

    def cond(carry):
        it, _, changed = carry
        return jnp.logical_and(it < num_iter, changed > 0.0)

    def body(carry):
        it, filled, _ = carry
        mask = filled != 0

        # bf16 hi/lo split of the depth activation (band + mask are exact).
        x_hi = filled.astype(jnp.bfloat16)
        x_lo = (filled - x_hi.astype(jnp.float32)).astype(jnp.bfloat16)

        # Fused row pass: one (HPp,HPp) @ (HPp, 3*WPp) bf16 matmul.
        rhs = jnp.concatenate([x_hi, x_lo, mask.astype(jnp.bfloat16)], axis=1)
        row = jnp.dot(a_bf16, rhs, preferred_element_type=jnp.float32)
        rs = row[:, :WPp] + row[:, WPp:2 * WPp]      # row-summed depths (f32)
        rc = row[:, 2 * WPp:]                        # row counts, exact ints

        # Fused column pass: one (3*HPp, WPp) @ (WPp, WPp) bf16 matmul.
        rs_hi = rs.astype(jnp.bfloat16)
        rs_lo = (rs - rs_hi.astype(jnp.float32)).astype(jnp.bfloat16)
        lhs = jnp.concatenate([rs_hi, rs_lo, rc.astype(jnp.bfloat16)], axis=0)
        col = jnp.dot(lhs, bm_bf16, preferred_element_type=jnp.float32)
        s = col[:HPp] + col[HPp:2 * HPp]             # 7x7 box sum
        c = col[2 * HPp:]                            # 7x7 box count (exact)

        # count == 0  =>  sum == 0, so this equals where(count>0, sum/count, 0)
        # without a select and without a transient NaN.
        avg = s * pl.reciprocal(jnp.maximum(c, 1.0), approx=False)

        new_filled = jnp.where(mask, filled, avg)
        # Exact early-exit flag: once nothing changes, the update is a fixed
        # point and all remaining iterations are dead work.
        changed = jnp.sum((new_filled != filled).astype(jnp.float32))
        return it + 1, new_filled, changed

    _, filled, _ = lax.while_loop(
        cond, body,
        (jnp.array(0, jnp.int32), x0, jnp.array(1.0, jnp.float32)))
    o_ref[...] = filled.astype(o_ref.dtype)


def _lane_target():
    """MXU/lane width target: 128 for v3/v4/v5*, 256 for v6e/v7x/unknown."""
    try:
        kind = jax.devices()[0].device_kind.lower()
    except Exception:
        kind = ""
    if ("v3" in kind) or ("v4" in kind) or ("v5" in kind):
        return 128
    return 256


def _cdiv(a, b):
    return -(-a // b)


def hole_filler(sparse_depth, kernel_size=KERNEL_SIZE, num_iter=NUM_ITER):
    """JAX equivalent of HoleFiller.forward.  sparse_depth: (B, 1, H, W)."""
    assert sparse_depth.ndim == 4 and sparse_depth.shape[1] == 1, \
        "Input must be of shape (B, 1, H, W)"
    B, _, H, W = sparse_depth.shape
    x = sparse_depth[:, 0, :, :].astype(jnp.float32)          # (B, H, W)

    lane_target = _lane_target()
    sublane_target = 128

    # Lane packing (cblk images side by side): always reach >= 128 lanes when
    # W allows it, but never pack more lane slots than the batch needs beyond
    # that minimum (extra zero images are cheap but not entirely free).
    cblk_cap = max(1, lane_target // W) if W < lane_target else 1
    cblk_min = max(1, _cdiv(128, W)) if W < 128 else 1
    cblk = min(cblk_cap, max(cblk_min, B))
    # Sublane packing (rblk images stacked): only as many as the batch needs.
    rblk_cap = max(1, sublane_target // H) if H < sublane_target else 1
    rblk = min(rblk_cap, max(1, _cdiv(B, cblk)))

    per_slab = rblk * cblk
    nblk = _cdiv(B, per_slab)
    Bp = nblk * per_slab

    HP, WP = rblk * H, cblk * W
    HPp = _cdiv(HP, 16) * 16          # bf16 sublane tile alignment
    WPp = _cdiv(WP, 128) * 128        # lane tile alignment (dense stores)

    if Bp != B:
        # Zero-pad the batch: all-zero images stay all-zero and the
        # block-diagonal bands prevent any cross-image leakage.
        x = jnp.concatenate([x, jnp.zeros((Bp - B, H, W), jnp.float32)], 0)

    # Pack rblk x cblk images into each slab (pure layout plumbing).
    xw = (x.reshape(nblk, rblk, cblk, H, W)
            .transpose(0, 1, 3, 2, 4)
            .reshape(nblk, HP, WP))
    if (HPp, WPp) != (HP, WP):
        xw = jnp.pad(xw, ((0, 0), (0, HPp - HP), (0, WPp - WP)))

    # VMEM budget: bf16 bands + transient int32 iota pairs + double-buffered
    # in/out slabs + ~20 live (HPp, WPp) f32-equivalent temporaries per iter.
    slab = HPp * WPp * 4
    band_bytes = (HPp * HPp + WPp * WPp) * 2
    iota_bytes = 8 * (HPp * HPp + WPp * WPp)
    vmem_need = band_bytes + iota_bytes + 4 * slab + 20 * slab
    try:
        phys = int(pltpu.get_tpu_info().vmem_capacity_bytes)
    except Exception:
        phys = 64 * 1024 * 1024          # v7x per-TC physical: safe floor
    vmem_cap = max(phys - 12 * 1024 * 1024, 32 * 1024 * 1024)   # headroom
    vmem_limit = int(min(max(vmem_need, 32 * 1024 * 1024), vmem_cap))

    cost = pl.CostEstimate(
        flops=int(6 * num_iter * nblk * HPp * WPp * (HPp + WPp)),
        transcendentals=int(num_iter * nblk * HPp * WPp),
        bytes_accessed=int(2 * nblk * slab),
    )

    outw = pl.pallas_call(
        functools.partial(_holefill_kernel, img_h=H, img_w=W,
                          rblk=rblk, cblk=cblk,
                          kernel_size=kernel_size, num_iter=num_iter),
        out_shape=jax.ShapeDtypeStruct((nblk, HPp, WPp), jnp.float32),
        grid=(nblk,),
        in_specs=[pl.BlockSpec((None, HPp, WPp), lambda i: (i, 0, 0))],
        out_specs=pl.BlockSpec((None, HPp, WPp), lambda i: (i, 0, 0)),
        compiler_params=pltpu.CompilerParams(
            dimension_semantics=("parallel",),
            vmem_limit_bytes=vmem_limit),
        cost_estimate=cost,
    )(xw)

    out = (outw[:, :HP, :WP]
           .reshape(nblk, rblk, H, cblk, W)
           .transpose(0, 1, 3, 2, 4)
           .reshape(Bp, H, W)[:B])
    return out[:, None, :, :].astype(sparse_depth.dtype)


def _reference(sparse_depth, kernel_size=KERNEL_SIZE, num_iter=NUM_ITER):
    """Pure-JAX reference mirroring the PyTorch forward (zero-padded conv)."""
    p = (kernel_size - 1) // 2
    x = sparse_depth.astype(jnp.float32)                      # (B, 1, H, W)
    k = jnp.ones((1, 1, kernel_size, kernel_size), jnp.float32)

    def conv(z):
        return lax.conv_general_dilated(
            z, k, window_strides=(1, 1), padding=[(p, p), (p, p)],
            dimension_numbers=("NCHW", "OIHW", "NCHW"))

    def body(_, filled):
        mask = filled != 0
        s = conv(filled)
        c = conv(mask.astype(jnp.float32))
        avg = jnp.where(c > 0, s / jnp.maximum(c, 1.0), 0.0)
        return jnp.where(mask, filled, avg)

    return lax.fori_loop(0, num_iter, body, x)


if __name__ == "__main__":
    key = jax.random.PRNGKey(0)
    B, H, W = 2, 16, 16
    k_depth, k_mask = jax.random.split(key)
    depth = jax.random.uniform(k_depth, (B, 1, H, W), jnp.float32,
                               minval=1.0, maxval=5.0)
    keep = jax.random.bernoulli(k_mask, 0.3, (B, 1, H, W)).astype(jnp.float32)
    sparse_depth = depth * keep  # zeros are holes

    out = jax.jit(hole_filler)(sparse_depth)
    jax.block_until_ready(out)

    ref = jax.jit(_reference)(sparse_depth)
    jax.block_until_ready(ref)

    assert out.shape == sparse_depth.shape
    assert bool(jnp.allclose(out, ref, rtol=1e-3, atol=1e-3)), \
        "mismatch vs reference"

    print("KERNEL_OK")
</pallas_src>

<mosaic_0001>
module attributes {stable_mosaic.version = 11 : i64} {
  func.func @_holefill_kernel(%arg0: i32, %arg1: memref<1x16x128xf32, #tpu.memory_space<vmem>>, %arg2: memref<1x16x128xf32, #tpu.memory_space<vmem>>) attributes {dimension_semantics = [#tpu.dimension_semantics<parallel>], iteration_bounds = array<i64: 1>, scalar_prefetch = 0 : i64, scratch_operands = 0 : i64, tpu.core_type = #tpu.core_type<tc>, window_params = [{transform_indices = @transform_0, window_bounds = array<i64: 1, 16, 128>}, {transform_indices = @transform_1, window_bounds = array<i64: 1, 16, 128>}]} {
    %0 = tpu.iota {dimensions = array<i32: 0>} : vector<16x16xi32>
    %1 = tpu.iota {dimensions = array<i32: 1>} : vector<16x16xi32>
    %2 = arith.subi %0, %1 : vector<16x16xi32>
    %3 = math.absi %2 : vector<16x16xi32>
    %c3_i32 = arith.constant 3 : i32
    %4 = vector.broadcast %c3_i32 : i32 to vector<16x16xi32>
    %5 = arith.cmpi sle, %3, %4 : vector<16x16xi32>
    %c0_i32 = arith.constant 0 : i32
    %6 = vector.broadcast %c0_i32 : i32 to vector<16x16xi32>
    %7 = arith.cmpi sge, %0, %6 : vector<16x16xi32>
    %c16_i32 = arith.constant 16 : i32
    %8 = vector.broadcast %c16_i32 : i32 to vector<16x16xi32>
    %9 = arith.cmpi slt, %0, %8 : vector<16x16xi32>
    %10 = arith.andi %7, %9 : vector<16x16xi1>
    %c0_i32_0 = arith.constant 0 : i32
    %11 = vector.broadcast %c0_i32_0 : i32 to vector<16x16xi32>
    %12 = arith.cmpi sge, %1, %11 : vector<16x16xi32>
    %c16_i32_1 = arith.constant 16 : i32
    %13 = vector.broadcast %c16_i32_1 : i32 to vector<16x16xi32>
    %14 = arith.cmpi slt, %1, %13 : vector<16x16xi32>
    %15 = arith.andi %12, %14 : vector<16x16xi1>
    %16 = arith.andi %10, %15 : vector<16x16xi1>
    %17 = arith.andi %5, %16 : vector<16x16xi1>
    %18 = arith.extui %17 : vector<16x16xi1> to vector<16x16xi32>
    %19 = arith.sitofp %18 : vector<16x16xi32> to vector<16x16xf32>
    %20 = arith.truncf %19 : vector<16x16xf32> to vector<16x16xbf16>
    %21 = tpu.iota {dimensions = array<i32: 0>} : vector<128x128xi32>
    %22 = tpu.iota {dimensions = array<i32: 1>} : vector<128x128xi32>
    %23 = arith.subi %21, %22 : vector<128x128xi32>
    %24 = math.absi %23 : vector<128x128xi32>
    %c3_i32_2 = arith.constant 3 : i32
    %25 = vector.broadcast %c3_i32_2 : i32 to vector<128x128xi32>
    %26 = arith.cmpi sle, %24, %25 : vector<128x128xi32>
    %c0_i32_3 = arith.constant 0 : i32
    %27 = vector.broadcast %c0_i32_3 : i32 to vector<128x128xi32>
    %28 = arith.cmpi sge, %21, %27 : vector<128x128xi32>
    %c16_i32_4 = arith.constant 16 : i32
    %29 = vector.broadcast %c16_i32_4 : i32 to vector<128x128xi32>
    %30 = arith.cmpi slt, %21, %29 : vector<128x128xi32>
    %31 = arith.andi %28, %30 : vector<128x128xi1>
    %c0_i32_5 = arith.constant 0 : i32
    %32 = vector.broadcast %c0_i32_5 : i32 to vector<128x128xi32>
    %33 = arith.cmpi sge, %22, %32 : vector<128x128xi32>
    %c16_i32_6 = arith.constant 16 : i32
    %34 = vector.broadcast %c16_i32_6 : i32 to vector<128x128xi32>
    %35 = arith.cmpi slt, %22, %34 : vector<128x128xi32>
    %36 = arith.andi %33, %35 : vector<128x128xi1>
    %37 = arith.andi %31, %36 : vector<128x128xi1>
    %c16_i32_7 = arith.constant 16 : i32
    %38 = vector.broadcast %c16_i32_7 : i32 to vector<128x128xi32>
    %39 = arith.cmpi sge, %21, %38 : vector<128x128xi32>
    %c32_i32 = arith.constant 32 : i32
    %40 = vector.broadcast %c32_i32 : i32 to vector<128x128xi32>
    %41 = arith.cmpi slt, %21, %40 : vector<128x128xi32>
    %42 = arith.andi %39, %41 : vector<128x128xi1>
    %c16_i32_8 = arith.constant 16 : i32
    %43 = vector.broadcast %c16_i32_8 : i32 to vector<128x128xi32>
    %44 = arith.cmpi sge, %22, %43 : vector<128x128xi32>
    %c32_i32_9 = arith.constant 32 : i32
    %45 = vector.broadcast %c32_i32_9 : i32 to vector<128x128xi32>
    %46 = arith.cmpi slt, %22, %45 : vector<128x128xi32>
    %47 = arith.andi %44, %46 : vector<128x128xi1>
    %48 = arith.andi %42, %47 : vector<128x128xi1>
    %49 = arith.ori %37, %48 : vector<128x128xi1>
    %c32_i32_10 = arith.constant 32 : i32
    %50 = vector.broadcast %c32_i32_10 : i32 to vector<128x128xi32>
    %51 = arith.cmpi sge, %21, %50 : vector<128x128xi32>
    %c48_i32 = arith.constant 48 : i32
    %52 = vector.broadcast %c48_i32 : i32 to vector<128x128xi32>
    %53 = arith.cmpi slt, %21, %52 : vector<128x128xi32>
    %54 = arith.andi %51, %53 : vector<128x128xi1>
    %c32_i32_11 = arith.constant 32 : i32
    %55 = vector.broadcast %c32_i32_11 : i32 to vector<128x128xi32>
    %56 = arith.cmpi sge, %22, %55 : vector<128x128xi32>
    %c48_i32_12 = arith.constant 48 : i32
    %57 = vector.broadcast %c48_i32_12 : i32 to vector<128x128xi32>
    %58 = arith.cmpi slt, %22, %57 : vector<128x128xi32>
    %59 = arith.andi %56, %58 : vector<128x128xi1>
    %60 = arith.andi %54, %59 : vector<128x128xi1>
    %61 = arith.ori %49, %60 : vector<128x128xi1>
    %c48_i32_13 = arith.constant 48 : i32
    %62 = vector.broadcast %c48_i32_13 : i32 to vector<128x128xi32>
    %63 = arith.cmpi sge, %21, %62 : vector<128x128xi32>
    %c64_i32 = arith.constant 64 : i32
    %64 = vector.broadcast %c64_i32 : i32 to vector<128x128xi32>
    %65 = arith.cmpi slt, %21, %64 : vector<128x128xi32>
    %66 = arith.andi %63, %65 : vector<128x128xi1>
    %c48_i32_14 = arith.constant 48 : i32
    %67 = vector.broadcast %c48_i32_14 : i32 to vector<128x128xi32>
    %68 = arith.cmpi sge, %22, %67 : vector<128x128xi32>
    %c64_i32_15 = arith.constant 64 : i32
    %69 = vector.broadcast %c64_i32_15 : i32 to vector<128x128xi32>
    %70 = arith.cmpi slt, %22, %69 : vector<128x128xi32>
    %71 = arith.andi %68, %70 : vector<128x128xi1>
    %72 = arith.andi %66, %71 : vector<128x128xi1>
    %73 = arith.ori %61, %72 : vector<128x128xi1>
    %c64_i32_16 = arith.constant 64 : i32
    %74 = vector.broadcast %c64_i32_16 : i32 to vector<128x128xi32>
    %75 = arith.cmpi sge, %21, %74 : vector<128x128xi32>
    %c80_i32 = arith.constant 80 : i32
    %76 = vector.broadcast %c80_i32 : i32 to vector<128x128xi32>
    %77 = arith.cmpi slt, %21, %76 : vector<128x128xi32>
    %78 = arith.andi %75, %77 : vector<128x128xi1>
    %c64_i32_17 = arith.constant 64 : i32
    %79 = vector.broadcast %c64_i32_17 : i32 to vector<128x128xi32>
    %80 = arith.cmpi sge, %22, %79 : vector<128x128xi32>
    %c80_i32_18 = arith.constant 80 : i32
    %81 = vector.broadcast %c80_i32_18 : i32 to vector<128x128xi32>
    %82 = arith.cmpi slt, %22, %81 : vector<128x128xi32>
    %83 = arith.andi %80, %82 : vector<128x128xi1>
    %84 = arith.andi %78, %83 : vector<128x128xi1>
    %85 = arith.ori %73, %84 : vector<128x128xi1>
    %c80_i32_19 = arith.constant 80 : i32
    %86 = vector.broadcast %c80_i32_19 : i32 to vector<128x128xi32>
    %87 = arith.cmpi sge, %21, %86 : vector<128x128xi32>
    %c96_i32 = arith.constant 96 : i32
    %88 = vector.broadcast %c96_i32 : i32 to vector<128x128xi32>
    %89 = arith.cmpi slt, %21, %88 : vector<128x128xi32>
    %90 = arith.andi %87, %89 : vector<128x128xi1>
    %c80_i32_20 = arith.constant 80 : i32
    %91 = vector.broadcast %c80_i32_20 : i32 to vector<128x128xi32>
    %92 = arith.cmpi sge, %22, %91 : vector<128x128xi32>
    %c96_i32_21 = arith.constant 96 : i32
    %93 = vector.broadcast %c96_i32_21 : i32 to vector<128x128xi32>
    %94 = arith.cmpi slt, %22, %93 : vector<128x128xi32>
    %95 = arith.andi %92, %94 : vector<128x128xi1>
    %96 = arith.andi %90, %95 : vector<128x128xi1>
    %97 = arith.ori %85, %96 : vector<128x128xi1>
    %c96_i32_22 = arith.constant 96 : i32
    %98 = vector.broadcast %c96_i32_22 : i32 to vector<128x128xi32>
    %99 = arith.cmpi sge, %21, %98 : vector<128x128xi32>
    %c112_i32 = arith.constant 112 : i32
    %100 = vector.broadcast %c112_i32 : i32 to vector<128x128xi32>
    %101 = arith.cmpi slt, %21, %100 : vector<128x128xi32>
    %102 = arith.andi %99, %101 : vector<128x128xi1>
    %c96_i32_23 = arith.constant 96 : i32
    %103 = vector.broadcast %c96_i32_23 : i32 to vector<128x128xi32>
    %104 = arith.cmpi sge, %22, %103 : vector<128x128xi32>
    %c112_i32_24 = arith.constant 112 : i32
    %105 = vector.broadcast %c112_i32_24 : i32 to vector<128x128xi32>
    %106 = arith.cmpi slt, %22, %105 : vector<128x128xi32>
    %107 = arith.andi %104, %106 : vector<128x128xi1>
    %108 = arith.andi %102, %107 : vector<128x128xi1>
    %109 = arith.ori %97, %108 : vector<128x128xi1>
    %c112_i32_25 = arith.constant 112 : i32
    %110 = vector.broadcast %c112_i32_25 : i32 to vector<128x128xi32>
    %111 = arith.cmpi sge, %21, %110 : vector<128x128xi32>
    %c128_i32 = arith.constant 128 : i32
    %112 = vector.broadcast %c128_i32 : i32 to vector<128x128xi32>
    %113 = arith.cmpi slt, %21, %112 : vector<128x128xi32>
    %114 = arith.andi %111, %113 : vector<128x128xi1>
    %c112_i32_26 = arith.constant 112 : i32
    %115 = vector.broadcast %c112_i32_26 : i32 to vector<128x128xi32>
    %116 = arith.cmpi sge, %22, %115 : vector<128x128xi32>
    %c128_i32_27 = arith.constant 128 : i32
    %117 = vector.broadcast %c128_i32_27 : i32 to vector<128x128xi32>
    %118 = arith.cmpi slt, %22, %117 : vector<128x128xi32>
    %119 = arith.andi %116, %118 : vector<128x128xi1>
    %120 = arith.andi %114, %119 : vector<128x128xi1>
    %121 = arith.ori %109, %120 : vector<128x128xi1>
    %122 = arith.andi %26, %121 : vector<128x128xi1>
    %123 = arith.extui %122 : vector<128x128xi1> to vector<128x128xi32>
    %124 = arith.sitofp %123 : vector<128x128xi32> to vector<128x128xf32>
    %125 = arith.truncf %124 : vector<128x128xf32> to vector<128x128xbf16>
    %c0 = arith.constant 0 : index
    %c0_28 = arith.constant 0 : index
    %c0_29 = arith.constant 0 : index
    %126 = vector.load %arg1[%c0, %c0_28, %c0_29] : memref<1x16x128xf32, #tpu.memory_space<vmem>>, vector<1x16x128xf32>
    %127 = vector.shape_cast %126 : vector<1x16x128xf32> to vector<16x128xf32>
    %c0_i32_30 = arith.constant 0 : i32
    %cst = arith.constant 1.000000e+00 : f32
    %128:3 = scf.while (%arg3 = %c0_i32_30, %arg4 = %127, %arg5 = %cst) : (i32, vector<16x128xf32>, f32) -> (i32, vector<16x128xf32>, f32) {
      %c50_i32 = arith.constant 50 : i32
      %132 = arith.cmpi slt, %arg3, %c50_i32 : i32
      %cst_34 = arith.constant 0.000000e+00 : f32
      %133 = arith.cmpf ogt, %arg5, %cst_34 : f32
      %134 = arith.andi %132, %133 : i1
      scf.condition(%134) %arg3, %arg4, %arg5 : i32, vector<16x128xf32>, f32
    } do {
    ^bb0(%arg3: i32, %arg4: vector<16x128xf32>, %arg5: f32):
      %cst_34 = arith.constant 0.000000e+00 : f32
      %132 = vector.broadcast %cst_34 : f32 to vector<16x128xf32>
      %133 = arith.cmpf one, %arg4, %132 : vector<16x128xf32>
      %134 = arith.truncf %arg4 : vector<16x128xf32> to vector<16x128xbf16>
      %135 = arith.extf %134 : vector<16x128xbf16> to vector<16x128xf32>
      %136 = arith.subf %arg4, %135 : vector<16x128xf32>
      %137 = arith.truncf %136 : vector<16x128xf32> to vector<16x128xbf16>
      %138 = arith.extui %133 : vector<16x128xi1> to vector<16x128xi32>
      %139 = arith.sitofp %138 : vector<16x128xi32> to vector<16x128xf32>
      %140 = arith.truncf %139 : vector<16x128xf32> to vector<16x128xbf16>
      %141 = tpu.concatenate %134, %137, %140 in 1 : vector<16x128xbf16>, vector<16x128xbf16>, vector<16x128xbf16> -> vector<16x384xbf16>
      %cst_35 = arith.constant dense<0.000000e+00> : vector<16x384xf32>
      %142 = tpu.matmul %20, %141, %cst_35 {dimension_numbers = #tpu.dot_dimension_numbers<[1], [0], [0], [1], [0, 0, 1, 1], [], []>} : vector<16x16xbf16>, vector<16x384xbf16>, vector<16x384xf32> -> vector<16x384xf32>
      %143 = vector.extract_strided_slice %142 {offsets = [0, 0], sizes = [16, 128], strides = [1, 1]} : vector<16x384xf32> to vector<16x128xf32>
      %144 = vector.extract_strided_slice %142 {offsets = [0, 128], sizes = [16, 128], strides = [1, 1]} : vector<16x384xf32> to vector<16x128xf32>
      %145 = arith.addf %143, %144 : vector<16x128xf32>
      %146 = vector.extract_strided_slice %142 {offsets = [0, 256], sizes = [16, 128], strides = [1, 1]} : vector<16x384xf32> to vector<16x128xf32>
      %147 = arith.truncf %145 : vector<16x128xf32> to vector<16x128xbf16>
      %148 = arith.extf %147 : vector<16x128xbf16> to vector<16x128xf32>
      %149 = arith.subf %145, %148 : vector<16x128xf32>
      %150 = arith.truncf %149 : vector<16x128xf32> to vector<16x128xbf16>
      %151 = arith.truncf %146 : vector<16x128xf32> to vector<16x128xbf16>
      %152 = tpu.concatenate %147, %150, %151 in 0 : vector<16x128xbf16>, vector<16x128xbf16>, vector<16x128xbf16> -> vector<48x128xbf16>
      %cst_36 = arith.constant dense<0.000000e+00> : vector<48x128xf32>
      %153 = tpu.matmul %152, %125, %cst_36 {dimension_numbers = #tpu.dot_dimension_numbers<[1], [0], [0], [1], [0, 0, 1, 1], [], []>} : vector<48x128xbf16>, vector<128x128xbf16>, vector<48x128xf32> -> vector<48x128xf32>
      %154 = vector.extract_strided_slice %153 {offsets = [0, 0], sizes = [16, 128], strides = [1, 1]} : vector<48x128xf32> to vector<16x128xf32>
      %155 = vector.extract_strided_slice %153 {offsets = [16, 0], sizes = [16, 128], strides = [1, 1]} : vector<48x128xf32> to vector<16x128xf32>
      %156 = arith.addf %154, %155 : vector<16x128xf32>
      %157 = vector.extract_strided_slice %153 {offsets = [32, 0], sizes = [16, 128], strides = [1, 1]} : vector<48x128xf32> to vector<16x128xf32>
      %cst_37 = arith.constant 1.000000e+00 : f32
      %158 = vector.broadcast %cst_37 : f32 to vector<16x128xf32>
      %159 = arith.maximumf %157, %158 : vector<16x128xf32>
      %160 = tpu.reciprocal %159 : vector<16x128xf32> -> vector<16x128xf32>
      %161 = arith.mulf %156, %160 : vector<16x128xf32>
      %162 = arith.select %133, %arg4, %161 : vector<16x128xi1>, vector<16x128xf32>
      %163 = arith.cmpf one, %162, %arg4 : vector<16x128xf32>
      %164 = arith.extui %163 : vector<16x128xi1> to vector<16x128xi32>
      %165 = arith.sitofp %164 : vector<16x128xi32> to vector<16x128xf32>
      %166 = vector.shape_cast %165 : vector<16x128xf32> to vector<1x16x128xf32>
      %cst_38 = arith.constant dense<0.000000e+00> : vector<1xf32>
      %167 = vector.multi_reduction <add>, %166, %cst_38 [1, 2] : vector<1x16x128xf32> to vector<1xf32>
      %168 = vector.shape_cast %167 : vector<1xf32> to vector<1x1x1xf32>
      %169 = vector.extract %168[0, 0, 0] : f32 from vector<1x1x1xf32>
      %c1_i32 = arith.constant 1 : i32
      %170 = arith.addi %arg3, %c1_i32 : i32
      scf.yield %170, %162, %169 : i32, vector<16x128xf32>, f32
    }
    %c0_31 = arith.constant 0 : index
    %c0_32 = arith.constant 0 : index
    %c0_33 = arith.constant 0 : index
    %129 = vector.load %arg2[%c0_31, %c0_32, %c0_33] : memref<1x16x128xf32, #tpu.memory_space<vmem>>, vector<1x16x128xf32>
    %130 = vector.shape_cast %129 : vector<1x16x128xf32> to vector<16x128xf32>
    %131 = vector.shape_cast %128#1 : vector<16x128xf32> to vector<1x16x128xf32>
    tpu.vector_store %arg2[%c0_31, %c0_32, %c0_33], %131 {strides = array<i32>} : memref<1x16x128xf32, #tpu.memory_space<vmem>>, vector<1x16x128xf32>,
    return
  }
  func.func @transform_0(%arg0: i32) -> (i32, i32, i32) {
    %c0_i32 = arith.constant 0 : i32
    %c0_i32_0 = arith.constant 0 : i32
    %c0_i32_1 = arith.constant 0 : i32
    return %arg0, %c0_i32, %c0_i32_0 : i32, i32, i32
  }
  func.func @transform_1(%arg0: i32) -> (i32, i32, i32) {
    %c0_i32 = arith.constant 0 : i32
    %c0_i32_0 = arith.constant 0 : i32
    %c0_i32_1 = arith.constant 0 : i32
    return %arg0, %c0_i32, %c0_i32_0 : i32, i32, i32
  }
}

</mosaic_0001>

<bundles_post_ra>
// kernel: hole_filler.1
= control target key start
LH: loop header
LB: loop body
LE: loop exit
PB: predicated region body
PF: predicated region fallthrough
CT: control target
= control target key end

     0   :  { %v9_v0 = vlaneseq  ;;  %v1527_v12 = vmov 0  ;;  %v1226_v13 = vmov 0.0   ;;  %v1529_v16 = vmov 0  ;;  %s1520_s0 = inlined_call_operand.vmem [shape: f32[1,16,128], index: 0, kind: input, shape index: {}]   ;;  %s1521_s1 = inlined_call_operand.vmem [shape: f32[1,16,128], index: 1, kind: output, shape index: {}]  }
   0x1   :  { %v1244_v1 = vld [vmem:[%s1520_s0] sm:$0xff]   ;;  %v1249_v2 = vld [vmem:[%s1520_s0 + $0x8] sm:$0xff]   ;;  %s1417_s0 = smov 0  }
   0x2   :  { %v10_v3 = vshrl.u32 %v9_v0, 7  ;;  %v1251_v4 = vand.u32 127, %v9_v0 }
   0x4   :  { %v11_v5 = vadd.s32 8, %v10_v3  ;;  %v14_v6 = vsub.s32 %v10_v3, %v1251_v4  ;;  %vm31_vm0 = vcmp.lt.s32.totalorder %v1251_v4, 16  ;;  %v42_v15 = vadd.s32 16, %v10_v3 }
   0x5   :  { %v43_v18 = vadd.s32 24, %v10_v3  ;;  %v44_v20 = vadd.s32 32, %v10_v3  ;;  %v45_v21 = vadd.s32 40, %v10_v3  ;;  %v46_v22 = vadd.s32 48, %v10_v3 }
   0x6   :  { %v15_v7 = vsub.s32 %v11_v5, %v1251_v4  ;;  %v17_v8 = vsub.s32 0, %v14_v6  ;;  %v47_v23 = vadd.s32 56, %v10_v3  ;;  %v56_v24 = vsub.s32 %v42_v15, %v1251_v4 }
   0x7   :  { %v48_v25 = vadd.s32 64, %v10_v3  ;;  %v49_v26 = vadd.s32 72, %v10_v3  ;;  %v50_v27 = vadd.s32 80, %v10_v3  ;;  %v51_v28 = vadd.s32 88, %v10_v3 }
   0x8   :  { %v1046_v9 = vmin.u32 %v17_v8, %v14_v6  ;;  %v20_v10 = vsub.s32 0, %v15_v7  ;;  %v57_v29 = vsub.s32 %v43_v18, %v1251_v4  ;;  %v52_v30 = vadd.s32 96, %v10_v3 }
   0x9   :  { %v53_v31 = vadd.s32 104, %v10_v3  ;;  %v58_v32 = vsub.s32 %v44_v20, %v1251_v4  ;;  %v59_v33 = vsub.s32 %v45_v21, %v1251_v4  ;;  %v60_v34 = vsub.s32 %v46_v22, %v1251_v4 }
   0xa   :  { %v1047_v11 = vmin.u32 %v20_v10, %v15_v7  ;;  %vm22_vm1 = vcmp.le.s32.totalorder %v1046_v9, 3  ;;  %v61_v35 = vsub.s32 %v47_v23, %v1251_v4  ;;  %v71_v36 = vsub.s32 0, %v56_v24 }
   0xb   :  { %vm1256_vm2 = vmand %vm22_vm1, %vm31_vm0  ;;  %v54_v37 = vadd.s32 112, %v10_v3  ;;  %v55_v38 = vadd.s32 120, %v10_v3  ;;  %v62_v39 = vsub.s32 %v48_v25, %v1251_v4  ;;  %v63_v40 = vsub.s32 %v49_v26, %v1251_v4 }
   0xc   :  { %v1528_v12 = vsel %vm1256_vm2, 4294967295, %v1527_v12  ;;  %vm23_vm3 = vcmp.le.s32.totalorder %v1047_v11, 3  ;;  %v1048_v14 = vsel %vm1256_vm2, 1.0, %v1226_v13  ;;  %v64_v41 = vsub.s32 %v50_v27, %v1251_v4 }
   0xd   :  { %vm1262_vm4 = vmand %vm23_vm3, %vm31_vm0  ;;  %v65_v42 = vsub.s32 %v51_v28, %v1251_v4  ;;  %v74_v43 = vsub.s32 0, %v57_v29  ;;  %v66_v44 = vsub.s32 %v52_v30, %v1251_v4  ;;  %v67_v45 = vsub.s32 %v53_v31, %v1251_v4 }
   0xe   :  { %v1530_v16 = vsel %vm1262_vm4, 4294967295, %v1529_v16  ;;  %v1049_v17 = vsel %vm1262_vm4, 1.0, %v1226_v13  ;;  %v77_v46 = vsub.s32 0, %v58_v32  ;;  %v80_v47 = vsub.s32 0, %v59_v33 }
   0xf   :  { %v1268_v19 = vpack.c.bf16 %v1049_v17, %v1048_v14  ;;  %v1050_v48 = vmin.u32 %v71_v36, %v56_v24  ;;  %v83_v49 = vsub.s32 0, %v60_v34  ;;  %v86_v50 = vsub.s32 0, %v61_v35 }
  0x10   :  { %vm230_vm5 = vcmp.ge.s32.totalorder %v1251_v4, 16  ;;  %vm231_vm6 = vcmp.lt.s32.totalorder %v1251_v4, 32  ;;  %vm313_vm7 = vcmp.ge.s32.totalorder %v1251_v4, 32  ;;  %vm314_vm8 = vcmp.lt.s32.totalorder %v1251_v4, 48 }
  0x11   :  { %vm396_vm9 = vcmp.ge.s32.totalorder %v1251_v4, 48  ;;  %v1051_v51 = vmin.u32 %v74_v43, %v57_v29  ;;  %vm1287_vm10 = vmand %vm230_vm5, %vm231_vm6  ;;  %vm397_vm11 = vcmp.lt.s32.totalorder %v1251_v4, 64  ;;  %vm479_vm12 = vcmp.ge.s32.totalorder %v1251_v4, 64 }
  0x12   :  { %vm480_vm13 = vcmp.lt.s32.totalorder %v1251_v4, 80  ;;  %v1052_v53 = vmin.u32 %v77_v46, %v58_v32  ;;  %v89_v54 = vsub.s32 0, %v62_v39  ;;  %vm1294_vm14 = vmand %vm313_vm7, %vm314_vm8  ;;  %vm562_vm15 = vcmp.ge.s32.totalorder %v1251_v4, 80 }
  0x13   :  { %vm563_vm0 = vcmp.lt.s32.totalorder %v1251_v4, 96  ;;  %v1053_v56 = vmin.u32 %v80_v47, %v59_v33  ;;  %v92_v57 = vsub.s32 0, %v63_v40  ;;  %vm1300_vm1 = vmand %vm396_vm9, %vm397_vm11  ;;  %vm645_vm3 = vcmp.ge.s32.totalorder %v1251_v4, 96 }
  0x14   :  { %vm646_vm5 = vcmp.lt.s32.totalorder %v1251_v4, 112  ;;  %v68_v59 = vsub.s32 %v54_v37, %v1251_v4  ;;  %v1054_v60 = vmin.u32 %v83_v49, %v60_v34  ;;  %v95_v61 = vsub.s32 0, %v64_v41  ;;  %vm1311_vm7 = vmand %vm479_vm12, %vm480_vm13 }
  0x15   :  { %vm112_vm6 = vcmp.le.s32.totalorder %v1050_v48, 3  ;;  %v69_v63 = vsub.s32 %v55_v38, %v1251_v4  ;;  %v1055_v0 = vmin.u32 %v86_v50, %v61_v35  ;;  %v98_v3 = vsub.s32 0, %v65_v42  ;;  %vm1320_vm9 = vmand %vm562_vm15, %vm563_vm0 }
  0x16   :  { %vm113_vm8 = vcmp.le.s32.totalorder %v1051_v51, 3  ;;  %v1056_v6 = vmin.u32 %v89_v54, %v62_v39  ;;  %v101_v7 = vsub.s32 0, %v66_v44  ;;  %vm114_vm11 = vcmp.le.s32.totalorder %v1052_v53, 3  ;;  %vm1326_vm12 = vmand %vm645_vm3, %vm646_vm5 }
  0x17   :  { %v1057_v9 = vmin.u32 %v92_v57, %v63_v40  ;;  %v104_v10 = vsub.s32 0, %v67_v45  ;;  %vm115_vm13 = vcmp.le.s32.totalorder %v1053_v56, 3  ;;  %vm1332_vm4 = vmand %vm112_vm6, %vm1287_vm10  ;;  %v1543_v11 = vmov 0 }
  0x18   :  { %v1544_v11 = vsel %vm1332_vm4, 4294967295, %v1543_v11  ;;  %v1058_v13 = vmin.u32 %v95_v61, %v64_v41  ;;  %v107_v14 = vsub.s32 0, %v68_v59  ;;  %vm116_vm15 = vcmp.le.s32.totalorder %v1054_v60, 3  ;;  %vm1338_vm0 = vmand %vm113_vm8, %vm1287_vm10 }
  0x19   :  { %v1545_v15 = vmov 0  ;;  %v1059_v17 = vmin.u32 %v98_v3, %v65_v42  ;;  %v110_v18 = vsub.s32 0, %v69_v63  ;;  %vm117_vm3 = vcmp.le.s32.totalorder %v1055_v0, 3  ;;  %vm1344_vm5 = vmand %vm114_vm11, %vm1294_vm14 }
  0x1a   :  { %v1546_v15 = vsel %vm1338_vm0, 4294967295, %v1545_v15  ;;  %v1547_v20 = vmov 0  ;;  %v1060_v21 = vmin.u32 %v101_v7, %v66_v44  ;;  %vm118_vm6 = vcmp.le.s32.totalorder %v1056_v6, 3  ;;  %vm1350_vm2 = vmand %vm115_vm13, %vm1294_vm14 }
  0x1b   :  { %v1548_v20 = vsel %vm1344_vm5, 4294967295, %v1547_v20  ;;  %v1549_v22 = vmov 0  ;;  %v1061_v23 = vmin.u32 %v104_v10, %v67_v45  ;;  %vm119_vm10 = vcmp.le.s32.totalorder %v1057_v9, 3  ;;  %vm1356_vm8 = vmand %vm116_vm15, %vm1300_vm1 }
  0x1c   :  { %v1550_v22 = vsel %vm1350_vm2, 4294967295, %v1549_v22  ;;  %v1062_v25 = vmin.u32 %v107_v14, %v68_v59  ;;  %vm120_vm11 = vcmp.le.s32.totalorder %v1058_v13, 3  ;;  %vm1362_vm0 = vmand %vm117_vm3, %vm1300_vm1  ;;  %v1553_v26 = vmov 0 }
  0x1d   :  { %v1554_v26 = vsel %vm1362_vm0, 4294967295, %v1553_v26  ;;  %v1063_v27 = vmin.u32 %v110_v18, %v69_v63  ;;  %vm121_vm14 = vcmp.le.s32.totalorder %v1059_v17, 3  ;;  %vm1368_vm13 = vmand %vm118_vm6, %vm1311_vm7  ;;  %vm122_vm15 = vcmp.le.s32.totalorder %v1060_v21, 3 }
  0x1e   :  { %vm1374_vm4 = vmand %vm119_vm10, %vm1311_vm7  ;;  %vm123_vm2 = vcmp.le.s32.totalorder %v1061_v23, 3  ;;  %vm124_vm3 = vcmp.le.s32.totalorder %v1062_v25, 3  ;;  %vm728_vm6 = vcmp.ge.s32.totalorder %v1251_v4, 112 }
  0x1f   :  { %vm1380_vm1 = vmand %vm120_vm11, %vm1320_vm9  ;;  %vm125_vm7 = vcmp.le.s32.totalorder %v1063_v27, 3 }
  0x20   :  { %vm1387_vm5 = vmand %vm121_vm14, %vm1320_vm9 }
  0x21   :  { %vm1393_vm10 = vmand %vm122_vm15, %vm1326_vm12 }
  0x22   :  { %vm1399_vm11 = vmand %vm123_vm2, %vm1326_vm12 }
  0x23   :  { %vm1403_vm0 = vmand %vm124_vm3, %vm728_vm6 }
  0x24   :  { %vm1407_vm9 = vmand %vm125_vm7, %vm728_vm6 }
  0x25 LB: > { %v1227_v35 = vmov 0   ;;  %v834_v36 = vpack.c.bf16 %v1216_v2, %v1220_v1  ;;  %v1228_v37 = vmov 0.0   ;;  %vm1525_vm2 = vcmp.ne.f32.partialorder %v1220_v1, 0.0  ;;  %vm1086_vm6 = vmpackc.low %vm1407_vm9, %vm1403_vm0  ;;  %s1025_s0 = sadd.s32 1, %s1224_s0   ;;  %s1224_s0 = sphi %s1417_s0, %s1025_s0   ;;  %v1220_v1 = vphi %v1244_v1, %v1582_v1   ;;  %v1216_v2 = vphi %v1249_v2, %v1581_v2  }
  0x26   : > { %881 = vmatprep.mubr.bf16.mxu0 %v1227_v35  ;;  %1117 = vmatprep.subr.bf16.mxu1 %v1228_v37  ;;  %vm1524_vm12 = vcmp.ne.f32.partialorder %v1216_v2, 0.0  ;;  %vm1526_vm15 = vmmov 0   ;;  %v1230_v40 = vmov 1.0|1.0   ;;  %vm845_vm3 = vcmask 130048   ;;  %vm1088_vm7 = vmpackc.low %vm1399_vm11, %vm1393_vm10  ;;  %p826_p0 = scmp.lt.s32.totalorder %s1025_s0, 50 }
  0x27   : > { %vm1083_vm14 = vmpackc.low %vm1524_vm12, %vm1525_vm2  ;;  %1119 = vmatprep.mubr.msk.bf16.mxu1 %vm1526_vm15, %v1228_v37  ;;  %v835_v38 = vunpack.c.l.bf16 %v834_v36  ;;  %v836_v39 = vunpack.c.h.bf16 %v834_v36 }
  0x28   : > { %1118 = vmatpush3.bf16.msk.msra.mxu1 %vm1083_vm14, %v1230_v40  ;;  %vm1090_vm14 = vmpackc.low %vm1387_vm5, %vm1380_vm1 }
  0x29   : > { %1151 = vmatprep.subr.bf16.mxu1 %v1228_v37  ;;  %v837_v41 = vsub.f32 %v1220_v1, %v835_v38  ;;  %v838_v42 = vsub.f32 %v1216_v2, %v836_v39 }
  0x2b   : > { %1120 = vmatmul.mubr.msk.bf16.vlgmr.msra.gmra.mxu1 %vm845_vm3, %v1268_v19  ;;  %v839_v43 = vpack.c.bf16 %v838_v42, %v837_v41 }
  0x2c   : > { %1159 = vmatpush3.bf16.msk.msra.mxu1 %vm1086_vm6, %v1230_v40  ;;  %1143 = vmatprep.mubr.msk.bf16.mxu1 %vm1526_vm15, %v1228_v37 }
  0x2d   : > { %1152 = vmatprep.subr.bf16.mxu1 %v1228_v37  ;;  %863 = vmatprep.subr.bf16.mxu0 %v839_v43 }
  0x2e   : > { %864 = vmatpush1.bf16.msra.mxu0 %v834_v36 }
  0x2f   : > { %1123 = vmatprep.subr.bf16.mxu0 %v1228_v37 }
  0x30   : > { %1160 = vmatpush3.bf16.msk.msra.mxu1 %vm1088_vm7, %v1230_v40 }
  0x31   : > { %1153 = vmatprep.subr.bf16.mxu1 %v1228_v37  ;;  %1082 = vmatmul.mubr.msk.bf16.vlgmr.msra.gmra.mxu0 %vm845_vm3, %v1268_v19  ;;  %vm1092_vm3 = vmpackc.low %vm1374_vm4, %vm1368_vm13 }
  0x32   : > { %1124 = vmatpush3.bf16.msk.msra.mxu0 %vm1086_vm6, %v1230_v40  ;;  %1139 = vmatprep.mubr.msk.bf16.mxu0 %vm1526_vm15, %v1228_v37  ;;  %vm1571_vm6 = vnez %v1554_v26 }
  0x33   : > { %1125 = vmatprep.subr.bf16.mxu0 %v1228_v37  ;;  %vm1094_vm12 = vmpackc.low %vm1571_vm6, %vm1356_vm8  ;;  %vm1574_vm6 = vnez %v1544_v11 }
  0x34   : > { %1161 = vmatpush3.bf16.msk.msra.mxu1 %vm1090_vm14, %v1230_v40 }
  0x35   : > { %1154 = vmatprep.subr.bf16.mxu1 %v1228_v37 }
  0x36   : > { %1126 = vmatpush3.bf16.msk.msra.mxu0 %vm1088_vm7, %v1230_v40  ;;  %vm1572_vm7 = vnez %v1548_v20 }
  0x37   : > { %1127 = vmatprep.subr.bf16.mxu0 %v1228_v37 }
  0x38   : > { %1162 = vmatpush3.bf16.msk.msra.mxu1 %vm1092_vm3, %v1230_v40 }
  0x39   : > { %1155 = vmatprep.subr.bf16.mxu1 %v1228_v37 }
  0x3a   : > { %1128 = vmatpush3.bf16.msk.msra.mxu0 %vm1090_vm14, %v1230_v40  ;;  %vm1573_vm14 = vnez %v1550_v22 }
  0x3b   : > { %1129 = vmatprep.subr.bf16.mxu0 %v1228_v37  ;;  %vm1096_vm2 = vmpackc.low %vm1573_vm14, %vm1572_vm7  ;;  %vm1577_vm7 = vnez %v1530_v16  ;;  %vm1579_vm14 = vcmp.ne.f32.partialorder %v1220_v1, 0.0 }
  0x3c   : > { %1163 = vmatpush3.bf16.msk.msra.mxu1 %vm1094_vm12, %v1230_v40 }
  0x3d   : > { %1156 = vmatprep.subr.bf16.mxu1 %v1228_v37 }
  0x3e   : > { %1130 = vmatpush3.bf16.msk.msra.mxu0 %vm1092_vm3, %v1230_v40  ;;  %vm1575_vm3 = vnez %v1546_v15 }
  0x3f   : > { %1131 = vmatprep.subr.bf16.mxu0 %v1228_v37  ;;  %vm1098_vm15 = vmpackc.low %vm1575_vm3, %vm1574_vm6  ;;  %vm1580_vm3 = vcmp.ne.f32.partialorder %v1216_v2, 0.0 }
  0x40   : > { %1164 = vmatpush3.bf16.msk.msra.mxu1 %vm1096_vm2, %v1230_v40 }
  0x41   : > { %1157 = vmatprep.subr.bf16.mxu1 %v1228_v37 }
  0x42   : > { %1132 = vmatpush3.bf16.msk.msra.mxu0 %vm1094_vm12, %v1230_v40  ;;  %vm1576_vm12 = vnez %v1528_v12 }
  0x43   : > { %1133 = vmatprep.subr.bf16.mxu0 %v1228_v37 }
  0x44   : > { %1165 = vmatpush3.bf16.msk.msra.mxu1 %vm1098_vm15, %v1230_v40 }
  0x45   : > { %1158 = vmatprep.subr.bf16.mxu1 %v1228_v37 }
  0x46   : > { %1134 = vmatpush3.bf16.msk.msra.mxu0 %vm1096_vm2, %v1230_v40  ;;  %vm1100_vm2 = vmpackc.low %vm1577_vm7, %vm1576_vm12 }
  0x47   : > { %1135 = vmatprep.subr.bf16.mxu0 %v1228_v37 }
  0x48   : > { %1166 = vmatpush3.bf16.msk.msra.mxu1 %vm1100_vm2, %v1230_v40 }
  0x4a   : > { %1136 = vmatpush3.bf16.msk.msra.mxu0 %vm1098_vm15, %v1230_v40  ;;  %vm1578_vm15 = vmmov 0  }
  0x4b   : > { %1137 = vmatprep.subr.bf16.mxu0 %v1228_v37 }
  0x4e   : > { %1138 = vmatpush3.bf16.msk.msra.mxu0 %vm1100_vm2, %v1230_v40 }
  0xeb   : > { %v926_v44 = vpop.f32.mrf.mxu1 }
  0xed   : > { %v1121_v45 = vpop.f32.mrf.mxu1 }
  0xef   : > { %v929_v46 = vpop.f32.mrf.mxu1 }
  0xf0   : > { %v941_v60 = vpack.c.bf16 %v929_v46, %v926_v44 }
  0xf1   : > { %v1122_v47 = vpop.f32.mrf.mxu1  ;;  %v883_v48 = vpop.f32.mrf.mxu0 }
  0xf3   : > { %v885_v49 = vpop.f32.mrf.mxu0 }
  0xf4   : > { %v933_v52 = vadd.f32 %v885_v49, %v883_v48 }
  0xf5   : > { %v887_v50 = vpop.f32.mrf.mxu0 }
  0xf7   : > { %v889_v51 = vpop.f32.mrf.mxu0 }
  0xf8   : > { %v934_v53 = vadd.f32 %v889_v51, %v887_v50 }
  0xfa   : > { %v935_v54 = vpack.c.bf16 %v934_v53, %v933_v52 }
  0xfc   : > { %v936_v55 = vunpack.c.l.bf16 %v935_v54  ;;  %v937_v56 = vunpack.c.h.bf16 %v935_v54  ;;  %1140 = vmatmul.mubr.bf16.vlgmr.msra.gmra.mxu0 %v935_v54 }
  0xfe   : > { %v938_v57 = vsub.f32 %v933_v52, %v936_v55  ;;  %v939_v58 = vsub.f32 %v934_v53, %v937_v56 }
 0x100   : > { %v940_v59 = vpack.c.bf16 %v939_v58, %v938_v57 }
 0x102   : > { %1144 = vmatmul.mubr.bf16.vlgmr.msra.gmra.mxu1 %v940_v59 }
 0x103   : > { %1147 = vmatprep.mubr.msk.bf16.mxu1 %vm1578_vm15, %v1228_v37 }
 0x10a   : > { %1148 = vmatmul.mubr.bf16.gmra.mxu1 %v941_v60 }
 0x1bc   : > { %v976_v61 = vpop.f32.mrf.mxu0 }
 0x1be   : > { %v1141_v62 = vpop.f32.mrf.mxu0 }
 0x1c0   : > { %v979_v63 = vpop.f32.mrf.mxu0 }
 0x1c2   : > { %v1142_v0 = vpop.f32.mrf.mxu0  ;;  %v984_v3 = vpop.f32.mrf.mxu1 }
 0x1c3   : > { %v999_v18 = vadd.f32 %v984_v3, %v976_v61 }
 0x1c4   : > { %v1145_v5 = vpop.f32.mrf.mxu1 }
 0x1c6   : > { %v987_v6 = vpop.f32.mrf.mxu1 }
 0x1c7   : > { %v1000_v25 = vadd.f32 %v987_v6, %v979_v63 }
 0x1c8   : > { %v1146_v7 = vpop.f32.mrf.mxu1 }
 0x1ca   : > { %v992_v8 = vpop.f32.mrf.mxu1 }
 0x1cb   : > { %v1001_v9 = vmax.f32 %v992_v8, 1.0 }
 0x1cc   : > { %v1149_v10 = vpop.f32.mrf.mxu1 }
 0x1cd   : > { %1198 = vrcp.f32 %v1001_v9 }
 0x1ce   : > { %v995_v13 = vpop.f32.mrf.mxu1 }
 0x1cf   : > { %v1002_v14 = vmax.f32 %v995_v13, 1.0 }
 0x1d0   : > { %v1150_v17 = vpop.f32.mrf.mxu1 }
 0x1d1   : > { %1200 = vrcp.f32 %v1002_v14 }
 0x1da   : > { %v1199_v21 = vpop.eup %1198 }
 0x1db   : > { %v1005_v23 = vmul.f32 %v1199_v21, %v999_v18 }
 0x1dd   : > { %v1007_v27 = vsel %vm1579_vm14, %v1220_v1, %v1005_v23  }
 0x1de   : > { %v1201_v35 = vpop.eup %1200  ;;  %vm1009_vm6 = vcmp.ne.f32.partialorder %v1007_v27, %v1220_v1 }
 0x1df   : > { %v1006_v36 = vmul.f32 %v1201_v35, %v1000_v25  ;;  %v1102_v39 = vsel %vm1009_vm6, 1.0, %v1228_v37 }
 0x1e1   : > { %v1008_v38 = vsel %vm1580_vm3, %v1216_v2, %v1006_v36  }
 0x1e2   : > { %vm1010_vm12 = vcmp.ne.f32.partialorder %v1008_v38, %v1216_v2  ;;  %v1581_v2 = vmov %v1008_v38 }
 0x1e3   : > { %v1103_v40 = vsel %vm1010_vm12, 1.0, %v1228_v37 }
 0x1e4   : > { %v1015_v41 = vadd.f32 %v1103_v40, %v1102_v39 }
 0x1e6   : > { %1016 = vadd.xlane.f32.xlu0 %v1015_v41 }
 0x26f   : > { %v1017_v42 = vpop.xlane.xlu0 %1016 }
 0x270   : > { %v1018_v43 = vrot.slane %v1017_v42, 4 }
 0x272   : > { %v1019_v44 = vadd.f32 %v1018_v43, %v1017_v42 }
 0x274   : > { %v1020_v45 = vrot.slane %v1019_v44, 2 }
 0x276   : > { %v1021_v46 = vadd.f32 %v1020_v45, %v1019_v44 }
 0x278   : > { %v1022_v47 = vrot.slane %v1021_v46, 1 }
 0x27a   : > { %v1023_v1 = vadd.f32 %v1022_v47, %v1021_v46 }
 0x27c   : > { %1167 = vpush %v1023_v1  ;;  %v1582_v1 = vmov %v1007_v27 }
 0x2ad   : > { %s1168_s10 = spop %1167 }
 0x2ae   : > { %p827_p1 = scmp.gt.f32.partialorder %s1168_s10, 0.0 }
 0x2b0   : > { %p828_p2 = pnand %p827_p1, %p826_p0 }
 0x2b1   :  { %1026 = vst [vmem:[%s1521_s1] sm:$0xff] (%p828_p2), %v1007_v27  ;;  %1027 = vst [vmem:[%s1521_s1 + $0x8] sm:$0xff] (%p828_p2), %v1008_v38 }
 0x2b2   :  { %831 = sbr.rel (!%p828_p2) target bundleno = 37 (0x25), region = 31 }

</bundles_post_ra>
